<compile_context>
chip_gen: v7x
topology: tpu7x:2x2x1
jax: 0.10.0
libtpu: 0.0.40
codegen_flags: <defaults>
</compile_context>

<pallas_src>
import jax
import jax.numpy as jnp
from jax import lax
from jax.experimental import pallas as pl
from jax.experimental.pallas import tpu as pltpu


def _round_up(a: int, b: int) -> int:
    return ((a + b - 1) // b) * b


# Tokens per in-kernel sub-step: caps the lane-padded f32 x temp (~2 MiB),
# h (~0.5 MiB) and z/softplus temps independent of the streamed tile size.
_CHUNK = 4096


def _autoencoder_kernel(x_ref, m_ref, weT_ref, beT_ref, wdT_ref, bdT_ref, oT_ref):
    # x_ref:  (tile, D_in) f32, token-major (lane padding only in VMEM, not HBM)
    # m_ref:  (1, tile)    f32, lane-dense token mask
    # oT_ref: (D_out, tile) f32, feature-major -> lane-dense stores
    tile = x_ref.shape[0]

    # Resident parameters (constant index_maps; fetched once).  Kept f32 --
    # they are tiny and the MXU has huge slack in this HBM-bound kernel.
    weT = weT_ref[...]          # (H, D_in)
    beT = beT_ref[...]          # (H, 1)
    wdT = wdT_ref[...]          # (D_out, H)
    bdT = bdT_ref[...]          # (D_out, 1)

    chunk = min(_CHUNK, tile)
    for off in range(0, tile, chunk):          # static, short -> unrolled
        cs = min(chunk, tile - off)            # always a multiple of 128
        x = x_ref[pl.ds(off, cs), :]           # (cs, D_in) f32
        m = m_ref[:, pl.ds(off, cs)]           # (1, cs)

        # ---- encoder: Linear + ReLU, result feature-major (H, cs) ----
        # Contract the minor dims of both operands (transposed contraction);
        # the implied relayout lands on idle MXU/XLU slots.
        h = lax.dot_general(weT, x, (((1,), (1,)), ((), ())),
                            preferred_element_type=jnp.float32) + beT
        h = jnp.maximum(h, 0.0) * m            # post-ReLU mask (soft-mask safe)

        # ---- decoder: Linear back to the output feature dim ----
        z = jnp.dot(wdT, h, preferred_element_type=jnp.float32) + bdT   # (D_out, cs)

        # ---- output head: softplus on features 0..1, identity on the rest ----
        sp = jnp.maximum(z, 0.0) + jnp.log1p(jnp.exp(-jnp.abs(z)))       # stable
        feat = lax.broadcasted_iota(jnp.int32, z.shape, 0)
        res = jnp.where(feat < 2, sp, z)

        # ---- full_mask multiply + lane-dense store ----
        oT_ref[:, pl.ds(off, cs)] = res * m


def autoencoder_forward(x, mask, we, be, wd, bd, *, tile_n: int = 16384):
    """x: (B, S, D_in) f32, mask: (B, S). Returns (B, S, D_out) f32."""
    B, S, D_in = x.shape
    H = we.shape[1]
    D_out = wd.shape[1]
    N = B * S

    # Pad the token axis only to a 128 multiple (lane granule).  Producers that
    # supply 128-aligned token counts hit a completely copy-free path.
    n_pad = _round_up(N, 128)
    tile = min(tile_n, n_pad)
    tile = max(128, (tile // 128) * 128)       # lane-dense token tile
    grid = (pl.cdiv(n_pad, tile),)             # partial final block allowed

    x2 = x.reshape(N, D_in)                    # no cast, no transpose
    m2 = mask.reshape(1, N).astype(jnp.float32)
    if n_pad != N:
        x2 = jnp.pad(x2, ((0, n_pad - N), (0, 0)))
        m2 = jnp.pad(m2, ((0, 0), (0, n_pad - N)))

    # Tiny resident parameters (wrapper reshapes are negligible).
    weT = we.T                                 # (H, D_in)
    beT = be.reshape(H, 1)                     # (H, 1)
    wdT = wd.T                                 # (D_out, H)
    bdT = bd.reshape(D_out, 1)                 # (D_out, 1)

    # VMEM budget @ tile=16384: 2x 8 MiB (lane-padded x blocks) + ~2 MiB mask/out
    # blocks + ~3.5 MiB chunk temps + params  ->  ~22 MiB.  48 MiB leaves room
    # to raise tile to 32768 and still fits v7x's 64 MiB per-core VMEM.
    outT = pl.pallas_call(
        _autoencoder_kernel,
        out_shape=jax.ShapeDtypeStruct((D_out, n_pad), jnp.float32),
        grid=grid,
        in_specs=[
            pl.BlockSpec((tile, D_in), lambda i: (i, 0)),   # x    (streamed, token-major)
            pl.BlockSpec((1, tile), lambda i: (0, i)),      # mask (streamed, lane-dense)
            pl.BlockSpec((H, D_in), lambda i: (0, 0)),      # We^T (resident)
            pl.BlockSpec((H, 1), lambda i: (0, 0)),         # be   (resident)
            pl.BlockSpec((D_out, H), lambda i: (0, 0)),     # Wd^T (resident)
            pl.BlockSpec((D_out, 1), lambda i: (0, 0)),     # bd   (resident)
        ],
        out_specs=pl.BlockSpec((D_out, tile), lambda i: (0, i)),
        compiler_params=pltpu.CompilerParams(
            dimension_semantics=("parallel",),              # megacore on v7x
            vmem_limit_bytes=48 * 1024 * 1024,
        ),
    )(x2, m2, weT, beT, wdT, bdT)

    # Accepted small transpose back to token-major; a feature-major consumer
    # could take outT[:, :N] directly and skip this pass.
    return outT[:, :N].T.reshape(B, S, D_out)


def _reference(x, mask, we, be, wd, bd):
    m = mask[..., None].astype(jnp.float32)
    h = jnp.maximum(jnp.einsum("bsd,dh->bsh", x, we) + be, 0.0) * m
    z = jnp.einsum("bsh,ho->bso", h, wd) + bd
    coords = jax.nn.softplus(z[:, :, :2])
    dims = z[:, :, 2:]
    res = jnp.concatenate([coords, dims], axis=2)
    return res * m


if __name__ == "__main__":
    B, S, D_in, H, D_out = 2, 8, 16, 32, 4

    key = jax.random.PRNGKey(0)
    kx, km, k1, k2, k3, k4 = jax.random.split(key, 6)

    x = jax.random.normal(kx, (B, S, D_in), dtype=jnp.float32)
    # binary mask over sequence positions (kernel also handles soft masks)
    mask = (jax.random.uniform(km, (B, S)) > 0.3).astype(jnp.float32)

    # deterministic synthetic parameters (no checkpoint)
    we = jax.random.normal(k1, (D_in, H), dtype=jnp.float32) * 0.1
    be = jax.random.normal(k2, (H,), dtype=jnp.float32) * 0.1
    wd = jax.random.normal(k3, (H, D_out), dtype=jnp.float32) * 0.1
    bd = jax.random.normal(k4, (D_out,), dtype=jnp.float32) * 0.1

    fwd = jax.jit(autoencoder_forward)
    out = jax.block_until_ready(fwd(x, mask, we, be, wd, bd))
    assert out.shape == (B, S, D_out)

    # Compare against the true f32 reference (x is NOT pre-quantized anymore);
    # remaining tolerance only covers MXU default-precision matmul rounding.
    ref = _reference(x, mask, we, be, wd, bd)
    assert jnp.allclose(out, ref, atol=5e-3, rtol=5e-3), "mismatch vs reference"

    print("KERNEL_OK")
</pallas_src>

<mosaic_0001>
module attributes {stable_mosaic.version = 11 : i64} {
  func.func @_autoencoder_kernel(%arg0: i32, %arg1: memref<128x16xf32, #tpu.memory_space<vmem>>, %arg2: memref<1x128xf32, #tpu.memory_space<vmem>>, %arg3: memref<32x16xf32, #tpu.memory_space<vmem>>, %arg4: memref<32x1xf32, #tpu.memory_space<vmem>>, %arg5: memref<4x32xf32, #tpu.memory_space<vmem>>, %arg6: memref<4x1xf32, #tpu.memory_space<vmem>>, %arg7: memref<4x128xf32, #tpu.memory_space<vmem>>) attributes {dimension_semantics = [#tpu.dimension_semantics<parallel>], iteration_bounds = array<i64: 1>, scalar_prefetch = 0 : i64, scratch_operands = 0 : i64, tpu.core_type = #tpu.core_type<tc>, window_params = [{transform_indices = @transform_0, window_bounds = array<i64: 128, 16>}, {transform_indices = @transform_1, window_bounds = array<i64: 1, 128>}, {pipeline_mode = #tpu.pipeline_mode<synchronous>, transform_indices = @transform_2, window_bounds = array<i64: 32, 16>}, {pipeline_mode = #tpu.pipeline_mode<synchronous>, transform_indices = @transform_3, window_bounds = array<i64: 32, 1>}, {pipeline_mode = #tpu.pipeline_mode<synchronous>, transform_indices = @transform_4, window_bounds = array<i64: 4, 32>}, {pipeline_mode = #tpu.pipeline_mode<synchronous>, transform_indices = @transform_5, window_bounds = array<i64: 4, 1>}, {transform_indices = @transform_6, window_bounds = array<i64: 4, 128>}]} {
    %c0 = arith.constant 0 : index
    %c0_0 = arith.constant 0 : index
    %0 = vector.load %arg3[%c0, %c0_0] : memref<32x16xf32, #tpu.memory_space<vmem>>, vector<32x16xf32>
    %c0_1 = arith.constant 0 : index
    %c0_2 = arith.constant 0 : index
    %1 = vector.load %arg4[%c0_1, %c0_2] : memref<32x1xf32, #tpu.memory_space<vmem>>, vector<32x1xf32>
    %c0_3 = arith.constant 0 : index
    %c0_4 = arith.constant 0 : index
    %2 = vector.load %arg5[%c0_3, %c0_4] : memref<4x32xf32, #tpu.memory_space<vmem>>, vector<4x32xf32>
    %c0_5 = arith.constant 0 : index
    %c0_6 = arith.constant 0 : index
    %3 = vector.load %arg6[%c0_5, %c0_6] : memref<4x1xf32, #tpu.memory_space<vmem>>, vector<4x1xf32>
    %c0_7 = arith.constant 0 : index
    %c0_8 = arith.constant 0 : index
    %4 = vector.load %arg1[%c0_7, %c0_8] : memref<128x16xf32, #tpu.memory_space<vmem>>, vector<128x16xf32>
    %c0_9 = arith.constant 0 : index
    %c0_10 = arith.constant 0 : index
    %5 = vector.load %arg2[%c0_9, %c0_10] : memref<1x128xf32, #tpu.memory_space<vmem>>, vector<1x128xf32>
    %cst = arith.constant dense<0.000000e+00> : vector<32x128xf32>
    %6 = tpu.matmul %0, %4, %cst {dimension_numbers = #tpu.dot_dimension_numbers<[1], [1], [0], [0], [0, 0, 1, 0], [], []>} : vector<32x16xf32>, vector<128x16xf32>, vector<32x128xf32> -> vector<32x128xf32>
    %7 = vector.broadcast %1 : vector<32x1xf32> to vector<32x128xf32>
    %8 = arith.addf %6, %7 : vector<32x128xf32>
    %cst_11 = arith.constant 0.000000e+00 : f32
    %9 = vector.broadcast %cst_11 : f32 to vector<32x128xf32>
    %10 = arith.maximumf %8, %9 : vector<32x128xf32>
    %11 = vector.broadcast %5 : vector<1x128xf32> to vector<32x128xf32>
    %12 = arith.mulf %10, %11 : vector<32x128xf32>
    %cst_12 = arith.constant dense<0.000000e+00> : vector<4x128xf32>
    %13 = tpu.matmul %2, %12, %cst_12 {dimension_numbers = #tpu.dot_dimension_numbers<[1], [0], [0], [1], [0, 0, 1, 1], [], []>} : vector<4x32xf32>, vector<32x128xf32>, vector<4x128xf32> -> vector<4x128xf32>
    %14 = vector.broadcast %3 : vector<4x1xf32> to vector<4x128xf32>
    %15 = arith.addf %13, %14 : vector<4x128xf32>
    %cst_13 = arith.constant 0.000000e+00 : f32
    %16 = vector.broadcast %cst_13 : f32 to vector<4x128xf32>
    %17 = arith.maximumf %15, %16 : vector<4x128xf32>
    %18 = math.absf %15 : vector<4x128xf32>
    %cst_14 = arith.constant 0.000000e+00 : f32
    %19 = vector.broadcast %cst_14 : f32 to vector<4x128xf32>
    %20 = arith.subf %19, %18 : vector<4x128xf32>
    %21 = math.exp %20 : vector<4x128xf32>
    %22 = math.log1p %21 : vector<4x128xf32>
    %23 = arith.addf %17, %22 : vector<4x128xf32>
    %24 = tpu.iota {dimensions = array<i32: 0>} : vector<4x128xi32>
    %c2_i32 = arith.constant 2 : i32
    %25 = vector.broadcast %c2_i32 : i32 to vector<4x128xi32>
    %26 = arith.cmpi slt, %24, %25 : vector<4x128xi32>
    %27 = arith.select %26, %23, %15 : vector<4x128xi1>, vector<4x128xf32>
    %28 = vector.broadcast %5 : vector<1x128xf32> to vector<4x128xf32>
    %29 = arith.mulf %27, %28 : vector<4x128xf32>
    %c0_15 = arith.constant 0 : index
    %c0_16 = arith.constant 0 : index
    %30 = vector.load %arg7[%c0_15, %c0_16] : memref<4x128xf32, #tpu.memory_space<vmem>>, vector<4x128xf32>
    tpu.vector_store %arg7[%c0_15, %c0_16], %29 {strides = array<i32>} : memref<4x128xf32, #tpu.memory_space<vmem>>, vector<4x128xf32>,
    return
  }
  func.func @transform_0(%arg0: i32) -> (i32, i32) {
    %c0_i32 = arith.constant 0 : i32
    %c0_i32_0 = arith.constant 0 : i32
    return %arg0, %c0_i32 : i32, i32
  }
  func.func @transform_1(%arg0: i32) -> (i32, i32) {
    %c0_i32 = arith.constant 0 : i32
    %c0_i32_0 = arith.constant 0 : i32
    return %c0_i32, %arg0 : i32, i32
  }
  func.func @transform_2(%arg0: i32) -> (i32, i32) {
    %c0_i32 = arith.constant 0 : i32
    %c0_i32_0 = arith.constant 0 : i32
    %c0_i32_1 = arith.constant 0 : i32
    return %c0_i32, %c0_i32_0 : i32, i32
  }
  func.func @transform_3(%arg0: i32) -> (i32, i32) {
    %c0_i32 = arith.constant 0 : i32
    %c0_i32_0 = arith.constant 0 : i32
    %c0_i32_1 = arith.constant 0 : i32
    return %c0_i32, %c0_i32_0 : i32, i32
  }
  func.func @transform_4(%arg0: i32) -> (i32, i32) {
    %c0_i32 = arith.constant 0 : i32
    %c0_i32_0 = arith.constant 0 : i32
    %c0_i32_1 = arith.constant 0 : i32
    return %c0_i32, %c0_i32_0 : i32, i32
  }
  func.func @transform_5(%arg0: i32) -> (i32, i32) {
    %c0_i32 = arith.constant 0 : i32
    %c0_i32_0 = arith.constant 0 : i32
    %c0_i32_1 = arith.constant 0 : i32
    return %c0_i32, %c0_i32_0 : i32, i32
  }
  func.func @transform_6(%arg0: i32) -> (i32, i32) {
    %c0_i32 = arith.constant 0 : i32
    %c0_i32_0 = arith.constant 0 : i32
    return %c0_i32, %arg0 : i32, i32
  }
}

</mosaic_0001>

<bundles_post_ra>
// kernel: autoencoder_forward.1
= control target key start
LH: loop header
LB: loop body
LE: loop exit
PB: predicated region body
PF: predicated region fallthrough
CT: control target
= control target key end

     0   :  { %vm70_vm0 = vcmask 130048   ;;  %v494_v3 = vmov 0   ;;  %v495_v35 = vmov 0.0|0.0   ;;  %vm496_vm2 = vmmov 0   ;;  %s659_s0 = inlined_call_operand.vmem [shape: f32[128,16], index: 0, kind: input, shape index: {}]   ;;  %s660_s2 = inlined_call_operand.vmem [shape: f32[32,16], index: 2, kind: input, shape index: {}]   ;;  %s661_s3 = inlined_call_operand.vmem [shape: f32[32,1], index: 3, kind: input, shape index: {}]   ;;  %s662_s5 = inlined_call_operand.vmem [shape: f32[4,1], index: 5, kind: input, shape index: {}]   ;;  %s663_s1 = inlined_call_operand.vmem [shape: f32[1,128], index: 1, kind: input, shape index: {}]   ;;  %s664_s4 = inlined_call_operand.vmem [shape: f32[4,32], index: 4, kind: input, shape index: {}]   ;;  %s665_s6 = inlined_call_operand.vmem [shape: f32[4,128], index: 6, kind: output, shape index: {}]  }
   0x1   :  { %v33_v0 = vld [vmem:[%s659_s0] sm:$0xff]  ;;  %v34_v1 = vld [vmem:[%s659_s0 + $0x8] sm:$0xff]  ;;  %vm541_vm1 = vmpackc.low %vm70_vm0, %vm70_vm0  ;;  %488 = vset.pattern.permute.xlu0 %v494_v3  ;;  %489 = vset.pattern.permute.xlu1 %v494_v3  ;;  %v497_v36 = vmov 0.0   ;;  %vm235_vm3 = vcmask 261120  }
   0x2   :  { %v430_v4 = vpack.c.bf16 %v34_v1, %v33_v0  ;;  %v35_v5 = vld [vmem:[%s659_s0 + $0x10] sm:$0xff]  ;;  %v36_v6 = vld [vmem:[%s659_s0 + $0x18] sm:$0xff]  ;;  %v23_v8 = vld [vmem:[%s660_s2] sm:$0xff]  ;;  %478 = vmatprep.subr.bf16.mxu1 %v495_v35  ;;  %427 = vmatprep.mubr.msk.f32.mxu1 %vm496_vm2, %v497_v36 }
   0x3   :  { %v436_v7 = vpack.c.bf16 %v36_v6, %v35_v5  ;;  %v37_v9 = vld [vmem:[%s659_s0 + $0x20] sm:$0xff]  ;;  %v38_v10 = vld [vmem:[%s659_s0 + $0x28] sm:$0xff]  ;;  %413 = vmatprep.mubr.msk.f32.mxu0 %vm70_vm0, %v23_v8  ;;  %v29_v12 = vld [vmem:[%s661_s3 + $0x10] sm:$0xff] }
   0x4   :  { %432 = vmatprep.subr.msk.bf16.mxu0 %vm541_vm1, %v430_v4  ;;  %v27_v11 = vld [vmem:[%s661_s3] sm:$0xff]  ;;  %62 = vperm.xlu1 %489, %v29_v12   ;;  %v442_v13 = vpack.c.bf16 %v38_v10, %v37_v9  ;;  %v28_v14 = vld [vmem:[%s661_s3 + $0x8] sm:$0xff]  ;;  %v30_v15 = vld [vmem:[%s661_s3 + $0x18] sm:$0xff] }
   0x5   :  { %435 = vmatpush3.bf16.xpose.msk.msra.mxu0 %vm541_vm1, %v430_v4  ;;  %52 = vperm.xlu0 %488, %v27_v11   ;;  %v32_v16 = vld [vmem:[%s662_s5] sm:$0xf]  ;;  %v39_v17 = vld [vmem:[%s659_s0 + $0x30] sm:$0xff]  ;;  %v40_v18 = vld [vmem:[%s659_s0 + $0x38] sm:$0xff] }
   0x6   :  { %438 = vmatprep.subr.msk.bf16.mxu0 %vm541_vm1, %v436_v7  ;;  %v448_v19 = vpack.c.bf16 %v40_v18, %v39_v17  ;;  %v41_v20 = vld [vmem:[%s659_s0 + $0x40] sm:$0xff]  ;;  %v42_v21 = vld [vmem:[%s659_s0 + $0x48] sm:$0xff]  ;;  %v43_v23 = vld [vmem:[%s659_s0 + $0x50] sm:$0xff] }
   0x7   :  { %v454_v22 = vpack.c.bf16 %v42_v21, %v41_v20  ;;  %v44_v24 = vld [vmem:[%s659_s0 + $0x58] sm:$0xff]  ;;  %v45_v26 = vld [vmem:[%s659_s0 + $0x60] sm:$0xff]  ;;  %v46_v27 = vld [vmem:[%s659_s0 + $0x68] sm:$0xff] }
   0x8   :  { %67 = vperm.xlu1 %489, %v30_v15   ;;  %v460_v25 = vpack.c.bf16 %v44_v24, %v43_v23  ;;  %v466_v28 = vpack.c.bf16 %v46_v27, %v45_v26  ;;  %v47_v29 = vld [vmem:[%s659_s0 + $0x70] sm:$0xff]  ;;  %v48_v30 = vld [vmem:[%s659_s0 + $0x78] sm:$0xff]  ;;  %v24_v32 = vld [vmem:[%s660_s2 + $0x8] sm:$0xff] }
   0x9   :  { %57 = vperm.xlu0 %488, %v28_v14   ;;  %v472_v31 = vpack.c.bf16 %v48_v30, %v47_v29  ;;  %v25_v33 = vld [vmem:[%s660_s2 + $0x10] sm:$0xff]  ;;  %v26_v34 = vld [vmem:[%s660_s2 + $0x18] sm:$0xff]  ;;  %v354_v43 = vld [vmem:[%s663_s1] ss:$0 sm:$0xff] }
   0xa   :  { %v31_v60 = vld [vmem:[%s664_s4] sm:$0xf] }
   0xd   :  { %441 = vmatpush3.bf16.xpose.msk.msra.mxu0 %vm541_vm1, %v436_v7  ;;  %232 = vperm.xlu0 %488, %v32_v16   ;;  %v324_v7 = vlaneseq }
   0xe   :  { %444 = vmatprep.subr.msk.bf16.mxu0 %vm541_vm1, %v442_v13 }
   0xf   :  { %v325_v10 = vshrl.u32 %v324_v7, 7 }
  0x11   :  { %vm326_vm5 = vcmp.lt.s32.totalorder %v325_v10, 2 }
  0x15   :  { %447 = vmatpush3.bf16.xpose.msk.msra.mxu0 %vm541_vm1, %v442_v13 }
  0x16   :  { %450 = vmatprep.subr.msk.bf16.mxu0 %vm541_vm1, %v448_v19 }
  0x1d   :  { %453 = vmatpush3.bf16.xpose.msk.msra.mxu0 %vm541_vm1, %v448_v19 }
  0x1e   :  { %456 = vmatprep.subr.msk.bf16.mxu0 %vm541_vm1, %v454_v22 }
  0x25   :  { %459 = vmatpush3.bf16.xpose.msk.msra.mxu0 %vm541_vm1, %v454_v22 }
  0x26   :  { %462 = vmatprep.subr.msk.bf16.mxu0 %vm541_vm1, %v460_v25 }
  0x2d   :  { %465 = vmatpush3.bf16.xpose.msk.msra.mxu0 %vm541_vm1, %v460_v25 }
  0x2e   :  { %468 = vmatprep.subr.msk.bf16.mxu0 %vm541_vm1, %v466_v28 }
  0x35   :  { %471 = vmatpush3.bf16.xpose.msk.msra.mxu0 %vm541_vm1, %v466_v28 }
  0x36   :  { %474 = vmatprep.subr.msk.bf16.mxu0 %vm541_vm1, %v472_v31 }
  0x3d   :  { %477 = vmatpush3.bf16.xpose.msk.msra.mxu0 %vm541_vm1, %v472_v31 }
  0x44   :  { %414 = vmatmul.mubr.msk.f32.vlgmr.msra.gmra.mrb[0].mxu0 %vm70_vm0, %v24_v32 }
  0x45   :  { %416 = vmatprep.mubr.msk.f32.mxu0 %vm70_vm0, %v25_v33 }
  0x48   :  { %417 = vmatmul.mubr.msk.f32.gmra.mrb[2].mxu0 %vm70_vm0, %v26_v34 }
  0x83   :  { %v63_v38 = vpop.permute.xlu1 %62 }
  0x84   :  { %v53_v37 = vpop.permute.xlu0 %52 }
  0x87   :  { %v68_v46 = vpop.permute.xlu1 %67 }
  0x88   :  { %v58_v39 = vpop.permute.xlu0 %57 }
  0x8c   :  { %v233_v61 = vpop.permute.xlu0 %232 }
 0x117   :  { %v415_v40 = vpop.f32.mrb[0].mxu0 }
 0x118   :  { %v203_v41 = vadd.f32 %v415_v40, %v58_v39  ;;  %v197_v42 = vpop.f32.mrb[1].mxu0 }
 0x119   :  { %v198_v44 = vadd.f32 %v197_v42, %v53_v37 }
 0x11a   :  { %v217_v45 = vmax.f32 %v203_v41, 0.0 }
 0x11b   :  { %v216_v47 = vmax.f32 %v198_v44, 0.0  ;;  %v418_v48 = vpop.f32.mrb[2].mxu0 }
 0x11c   :  { %v227_v49 = vmul.f32 %v354_v43, %v217_v45  ;;  %v213_v50 = vadd.f32 %v418_v48, %v68_v46  ;;  %v207_v51 = vpop.f32.mrb[3].mxu0 }
 0x11d   :  { %v226_v52 = vmul.f32 %v354_v43, %v216_v47  ;;  %v208_v53 = vadd.f32 %v207_v51, %v63_v38 }
 0x11e   :  { %v219_v54 = vmax.f32 %v213_v50, 0.0 }
 0x11f   :  { %v218_v55 = vmax.f32 %v208_v53, 0.0  ;;  %v479_v56 = vpack.c.bf16 %v227_v49, %v226_v52 }
 0x120   :  { %v229_v57 = vmul.f32 %v354_v43, %v219_v54 }
 0x121   :  { %v228_v58 = vmul.f32 %v354_v43, %v218_v55  ;;  %480 = vmatpush3.bf16.msra.mxu1 %v479_v56 }
 0x122   :  { %481 = vmatprep.subr.bf16.mxu1 %v495_v35 }
 0x123   :  { %v482_v59 = vpack.c.bf16 %v229_v57, %v228_v58 }
 0x125   :  { %483 = vmatpush3.bf16.msra.mxu1 %v482_v59 }
 0x128   :  { %428 = vmatmul.mubr.msk.f32.vlgmr.msra.gmra.mrb[0].mxu1 %vm235_vm3, %v31_v60 }
 0x1fb   :  { %v305_v62 = vpop.f32.mrb[0].mxu1 }
 0x1fc   :  { %v306_v63 = vadd.f32 %v305_v62, %v233_v61  ;;  %v429_v0 = vpop.f32.mrb[1].mxu1 }
 0x1fe   :  { %v310_v1 = vand.u32 2147483647, %v306_v63  ;;  %v309_v14 = vmax.f32 %v306_v63, 0.0 }
 0x200   :  { %v311_v2 = vsub.f32 0.0, %v310_v1 }
 0x202   :  { %v312_v3 = vmul.f32 1.442695, %v311_v2 }
 0x204   :  { %490 = vpow2.f32 %v312_v3 }
 0x20e   :  { %v491_v4 = vpop.eup %490 }
 0x20f   :  { %v314_v5 = vadd.f32 1.0, %v491_v4  ;;  %v317_v6 = vmul.f32 -0.5, %v491_v4  ;;  %v320_v9 = vand.u32 2147483647, %v491_v4 }
 0x211   :  { %492 = vlog2.f32 %v314_v5  ;;  %v318_v8 = vadd.f32 1.0, %v317_v6  ;;  %vm321_vm4 = vcmp.lt.f32.partialorder %v320_v9, 0.0004427343 }
 0x213   :  { %v319_v13 = vmul.f32 %v491_v4, %v318_v8 }
 0x21b   :  { %v493_v11 = vpop.eup %492 }
 0x21c   :  { %v316_v12 = vmul.f32 0.6931472, %v493_v11 }
 0x21e   :  { %v322_v15 = vsel %vm321_vm4, %v319_v13, %v316_v12 }
 0x21f   :  { %v323_v16 = vadd.f32 %v322_v15, %v309_v14 }
 0x221   :  { %v327_v17 = vsel %vm326_vm5, %v323_v16, %v306_v63 }
 0x222   :  { %v328_v18 = vmul.f32 %v354_v43, %v327_v17 }
 0x224   :  { %329 = vst [vmem:[%s665_s6] sm:$0xf] %v328_v18 }

</bundles_post_ra>
